<compile_context>
chip_gen: v6e
topology: v6e:2x2x1
jax: 0.10.0
libtpu: 0.0.40
codegen_flags: <defaults>
</compile_context>

<pallas_src>
import functools

import jax
import jax.numpy as jnp
from jax.experimental import pallas as pl
from jax.experimental.pallas import tpu as pltpu

_ROW_ALIGN = 16      # bf16 sublane packing granularity -> keep slab offsets aligned
_MAX_TILE_B = 2048


def _round_up(x, m):
    return ((x + m - 1) // m) * m


def _critic_kernel(state_ref, action_ref, w_ref, b_ref, out_ref,
                   *, S, A, S_pad, A_pad, H2):
    st = state_ref[...].astype(jnp.bfloat16)     # (TB, S)
    ac = action_ref[...].astype(jnp.bfloat16)    # (TB, A)
    b = b_ref[...]                               # (3, 2H) f32
    r2 = S_pad + A_pad                           # start row of layer-2 block
    r3 = r2 + H2                                 # start row of layer-3 block

    # layer 1 (both heads fused): xu @ [w1|w4] without materializing concat.
    h = (jnp.dot(st, w_ref[0:S, :], preferred_element_type=jnp.float32)
         + jnp.dot(ac, w_ref[S_pad:S_pad + A, :],
                   preferred_element_type=jnp.float32)
         + b[0:1, :])
    h = jnp.maximum(h, 0.0)

    # layer 2: block-diag [w2 0; 0 w5].
    h = (jnp.dot(h.astype(jnp.bfloat16), w_ref[r2:r3, :],
                 preferred_element_type=jnp.float32) + b[1:2, :])
    h = jnp.maximum(h, 0.0)

    # layer 3: block-diag [w3 0; 0 w6] (lane-padded); only lanes 0,1 are real.
    q = (jnp.dot(h.astype(jnp.bfloat16), w_ref[r3:r3 + H2, :],
                 preferred_element_type=jnp.float32) + b[2:3, :])

    # lane-dense store: row 0 = q1, row 1 = q2 over TILE_B lanes.
    out_ref[...] = q[:, :2].T.astype(out_ref.dtype)


def _choose_tile(B):
    if B < 256:
        return B                                   # single tile (block == full array)
    # >=2 tiles so v7x's two TensorCores both get work; multiples of 128 keep
    # the lane-dense (2, TILE_B) output block legal; capped for VMEM headroom.
    return min(_MAX_TILE_B, _round_up((B + 1) // 2, 128))


@jax.jit
def critic_forward(state, action, packed_params):
    """Returns (q1, q2), each of shape (B, 1), matching Critic.forward."""
    wslab, bslab = packed_params
    B, S = state.shape
    A = action.shape[1]
    H2 = wslab.shape[1]
    S_pad, A_pad = _round_up(S, _ROW_ALIGN), _round_up(A, _ROW_ALIGN)
    assert wslab.shape[0] == S_pad + A_pad + 2 * H2, "bad packed weight slab"

    TILE_B = _choose_tile(B)
    grid = (pl.cdiv(B, TILE_B),)

    kernel = functools.partial(_critic_kernel, S=S, A=A,
                               S_pad=S_pad, A_pad=A_pad, H2=H2)

    out = pl.pallas_call(
        kernel,
        out_shape=jax.ShapeDtypeStruct((2, B), jnp.float32),
        grid_spec=pltpu.PrefetchScalarGridSpec(
            num_scalar_prefetch=0,
            grid=grid,
            in_specs=[
                pl.BlockSpec((TILE_B, S), lambda i: (i, 0)),    # state tile
                pl.BlockSpec((TILE_B, A), lambda i: (i, 0)),    # action tile
                pl.BlockSpec(wslab.shape, lambda i: (0, 0)),    # weights resident
                pl.BlockSpec(bslab.shape, lambda i: (0, 0)),    # biases resident
            ],
            out_specs=pl.BlockSpec((2, TILE_B), lambda i: (0, i)),
        ),
        compiler_params=pltpu.CompilerParams(
            dimension_semantics=("parallel",),
            vmem_limit_bytes=32 * 1024 * 1024),
    )(state, action, wslab, bslab)

    return out[0, :, None], out[1, :, None]


# ----------------------- parameter init & packing --------------------------

def _xavier_uniform(key, fan_in, fan_out, dtype=jnp.float32):
    # torch.nn.init.xavier_uniform_ gain=1: U(-a, a), a = sqrt(6/(fan_in+fan_out))
    bound = (6.0 / (fan_in + fan_out)) ** 0.5
    return jax.random.uniform(key, (fan_in, fan_out), dtype, -bound, bound)


def init_critic_params(key, state_size, action_size, hidden=64):
    """weights_init_: xavier_uniform W, zero bias.

    Weights stored as (in, out) so the kernel computes x @ W; biases as (out,).
    """
    d_in = state_size + action_size
    keys = jax.random.split(key, 6)
    dims = [(d_in, hidden), (hidden, hidden), (hidden, 1),
            (d_in, hidden), (hidden, hidden), (hidden, 1)]
    params = []
    for k, (fi, fo) in zip(keys, dims):
        params.append(_xavier_uniform(k, fi, fo))
        params.append(jnp.zeros((fo,), jnp.float32))
    return tuple(params)


def pack_critic_params(params, state_size, action_size, hidden=64):
    """Pack 12 per-layer tensors into one bf16 weight slab + one f32 bias slab.

    Weight slab rows (16-aligned offsets, bf16 packing), lane width = 2*hidden:
      [0, S)                     : [w1|w4] state rows
      [S_pad, S_pad+A)           : [w1|w4] action rows
      [S_pad+A_pad, +2H)         : block-diag [w2 0; 0 w5]
      next 2H rows               : block-diag [w3 0; 0 w6] (lane-padded)
    Bias slab rows: [b1|b4], [b2|b5], [b3, b6, 0...].
    """
    (w1, b1, w2, b2, w3, b3, w4, b4, w5, b5, w6, b6) = params
    S, A, H = state_size, action_size, hidden
    H2 = 2 * H
    S_pad, A_pad = _round_up(S, _ROW_ALIGN), _round_up(A, _ROW_ALIGN)

    w1f = jnp.concatenate([w1, w4], axis=1)                       # (S+A, 2H)
    w1s = jnp.zeros((S_pad, H2), jnp.float32).at[:S].set(w1f[:S])
    w1a = jnp.zeros((A_pad, H2), jnp.float32).at[:A].set(w1f[S:])
    w2bd = (jnp.zeros((H2, H2), jnp.float32)
            .at[:H, :H].set(w2).at[H:, H:].set(w5))
    w3bd = (jnp.zeros((H2, H2), jnp.float32)
            .at[:H, 0:1].set(w3).at[H:, 1:2].set(w6))
    wslab = jnp.concatenate([w1s, w1a, w2bd, w3bd], axis=0)       # (S_pad+A_pad+4H, 2H)
    wslab = wslab.astype(jnp.bfloat16)                            # bf16 MXU operands

    b1f = jnp.concatenate([b1, b4])                               # (2H,)
    b2f = jnp.concatenate([b2, b5])
    b3f = jnp.zeros((H2,), jnp.float32).at[0].set(b3[0]).at[1].set(b6[0])
    bslab = jnp.stack([b1f, b2f, b3f], axis=0)                    # (3, 2H) f32
    return wslab, bslab


# ------------------------------ reference ---------------------------------

def _reference_forward(state, action, params, matmul_dtype=jnp.float32):
    (w1, b1, w2, b2, w3, b3, w4, b4, w5, b5, w6, b6) = params

    def lin(x, w, b):
        return jnp.dot(x.astype(matmul_dtype), w.astype(matmul_dtype),
                       preferred_element_type=jnp.float32) + b

    xu = jnp.concatenate([state, action], axis=1)
    x1 = jax.nn.relu(lin(xu, w1, b1))
    x1 = jax.nn.relu(lin(x1, w2, b2))
    x1 = lin(x1, w3, b3)
    x2 = jax.nn.relu(lin(xu, w4, b4))
    x2 = jax.nn.relu(lin(x2, w5, b5))
    x2 = lin(x2, w6, b6)
    return x1, x2


if __name__ == "__main__":
    state_size, action_size, hidden, batch = 8, 4, 64, 8

    key = jax.random.PRNGKey(0)
    k_state, k_action, k_params = jax.random.split(key, 3)

    state = jax.random.normal(k_state, (batch, state_size), jnp.float32)
    action = jax.random.normal(k_action, (batch, action_size), jnp.float32)
    params = init_critic_params(k_params, state_size, action_size, hidden)
    packed = pack_critic_params(params, state_size, action_size, hidden)

    q1, q2 = critic_forward(state, action, packed)
    jax.block_until_ready((q1, q2))
    assert q1.shape == (batch, 1) and q2.shape == (batch, 1)

    # tight check vs bf16-matched reference (same matmul input precision)
    rb1, rb2 = _reference_forward(state, action, params, jnp.bfloat16)
    assert jnp.allclose(q1, rb1, atol=1e-3, rtol=1e-3), "q1 mismatch (bf16 ref)"
    assert jnp.allclose(q2, rb2, atol=1e-3, rtol=1e-3), "q2 mismatch (bf16 ref)"

    # loose sanity check vs full-f32 reference (bf16 matmul rounding)
    rf1, rf2 = _reference_forward(state, action, params, jnp.float32)
    assert jnp.allclose(q1, rf1, atol=5e-2, rtol=5e-2), "q1 mismatch (f32 ref)"
    assert jnp.allclose(q2, rf2, atol=5e-2, rtol=5e-2), "q2 mismatch (f32 ref)"

    print("KERNEL_OK")
</pallas_src>

<mosaic_0001>
module attributes {stable_mosaic.version = 11 : i64} {
  func.func @_critic_kernel(%arg0: i32, %arg1: memref<8x8xf32, #tpu.memory_space<vmem>>, %arg2: memref<8x4xf32, #tpu.memory_space<vmem>>, %arg3: memref<288x128xbf16, #tpu.memory_space<vmem>>, %arg4: memref<3x128xf32, #tpu.memory_space<vmem>>, %arg5: memref<2x8xf32, #tpu.memory_space<vmem>>) attributes {dimension_semantics = [#tpu.dimension_semantics<parallel>], iteration_bounds = array<i64: 1>, scalar_prefetch = 0 : i64, scratch_operands = 0 : i64, tpu.core_type = #tpu.core_type<tc>, window_params = [{transform_indices = @transform_0, window_bounds = array<i64: 8, 8>}, {transform_indices = @transform_1, window_bounds = array<i64: 8, 4>}, {pipeline_mode = #tpu.pipeline_mode<synchronous>, transform_indices = @transform_2, window_bounds = array<i64: 288, 128>}, {pipeline_mode = #tpu.pipeline_mode<synchronous>, transform_indices = @transform_3, window_bounds = array<i64: 3, 128>}, {transform_indices = @transform_4, window_bounds = array<i64: 2, 8>}]} {
    %c0 = arith.constant 0 : index
    %c0_0 = arith.constant 0 : index
    %0 = vector.load %arg1[%c0, %c0_0] : memref<8x8xf32, #tpu.memory_space<vmem>>, vector<8x8xf32>
    %1 = arith.truncf %0 : vector<8x8xf32> to vector<8x8xbf16>
    %c0_1 = arith.constant 0 : index
    %c0_2 = arith.constant 0 : index
    %2 = vector.load %arg2[%c0_1, %c0_2] : memref<8x4xf32, #tpu.memory_space<vmem>>, vector<8x4xf32>
    %3 = arith.truncf %2 : vector<8x4xf32> to vector<8x4xbf16>
    %c0_3 = arith.constant 0 : index
    %c0_4 = arith.constant 0 : index
    %4 = vector.load %arg4[%c0_3, %c0_4] : memref<3x128xf32, #tpu.memory_space<vmem>>, vector<3x128xf32>
    %c0_5 = arith.constant 0 : index
    %c0_6 = arith.constant 0 : index
    %5 = vector.load %arg3[%c0_5, %c0_6] : memref<288x128xbf16, #tpu.memory_space<vmem>>, vector<8x128xbf16>
    %cst = arith.constant dense<0.000000e+00> : vector<8x128xf32>
    %6 = tpu.matmul %1, %5, %cst {dimension_numbers = #tpu.dot_dimension_numbers<[1], [0], [0], [1], [0, 0, 1, 1], [], []>} : vector<8x8xbf16>, vector<8x128xbf16>, vector<8x128xf32> -> vector<8x128xf32>
    %c16 = arith.constant 16 : index
    %c0_7 = arith.constant 0 : index
    %7 = vector.load %arg3[%c16, %c0_7] : memref<288x128xbf16, #tpu.memory_space<vmem>>, vector<4x128xbf16>
    %cst_8 = arith.constant dense<0.000000e+00> : vector<8x128xf32>
    %8 = tpu.matmul %3, %7, %cst_8 {dimension_numbers = #tpu.dot_dimension_numbers<[1], [0], [0], [1], [0, 0, 1, 1], [], []>} : vector<8x4xbf16>, vector<4x128xbf16>, vector<8x128xf32> -> vector<8x128xf32>
    %9 = arith.addf %6, %8 : vector<8x128xf32>
    %10 = vector.extract_strided_slice %4 {offsets = [0, 0], sizes = [1, 128], strides = [1, 1]} : vector<3x128xf32> to vector<1x128xf32>
    %11 = vector.broadcast %10 : vector<1x128xf32> to vector<8x128xf32>
    %12 = arith.addf %9, %11 : vector<8x128xf32>
    %cst_9 = arith.constant 0.000000e+00 : f32
    %13 = vector.broadcast %cst_9 : f32 to vector<8x128xf32>
    %14 = arith.maximumf %12, %13 : vector<8x128xf32>
    %15 = arith.truncf %14 : vector<8x128xf32> to vector<8x128xbf16>
    %c32 = arith.constant 32 : index
    %c0_10 = arith.constant 0 : index
    %16 = vector.load %arg3[%c32, %c0_10] : memref<288x128xbf16, #tpu.memory_space<vmem>>, vector<128x128xbf16>
    %cst_11 = arith.constant dense<0.000000e+00> : vector<8x128xf32>
    %17 = tpu.matmul %15, %16, %cst_11 {dimension_numbers = #tpu.dot_dimension_numbers<[1], [0], [0], [1], [0, 0, 1, 1], [], []>} : vector<8x128xbf16>, vector<128x128xbf16>, vector<8x128xf32> -> vector<8x128xf32>
    %18 = vector.extract_strided_slice %4 {offsets = [1, 0], sizes = [1, 128], strides = [1, 1]} : vector<3x128xf32> to vector<1x128xf32>
    %19 = vector.broadcast %18 : vector<1x128xf32> to vector<8x128xf32>
    %20 = arith.addf %17, %19 : vector<8x128xf32>
    %cst_12 = arith.constant 0.000000e+00 : f32
    %21 = vector.broadcast %cst_12 : f32 to vector<8x128xf32>
    %22 = arith.maximumf %20, %21 : vector<8x128xf32>
    %23 = arith.truncf %22 : vector<8x128xf32> to vector<8x128xbf16>
    %c160 = arith.constant 160 : index
    %c0_13 = arith.constant 0 : index
    %24 = vector.load %arg3[%c160, %c0_13] : memref<288x128xbf16, #tpu.memory_space<vmem>>, vector<128x128xbf16>
    %cst_14 = arith.constant dense<0.000000e+00> : vector<8x128xf32>
    %25 = tpu.matmul %23, %24, %cst_14 {dimension_numbers = #tpu.dot_dimension_numbers<[1], [0], [0], [1], [0, 0, 1, 1], [], []>} : vector<8x128xbf16>, vector<128x128xbf16>, vector<8x128xf32> -> vector<8x128xf32>
    %26 = vector.extract_strided_slice %4 {offsets = [2, 0], sizes = [1, 128], strides = [1, 1]} : vector<3x128xf32> to vector<1x128xf32>
    %27 = vector.broadcast %26 : vector<1x128xf32> to vector<8x128xf32>
    %28 = arith.addf %25, %27 : vector<8x128xf32>
    %29 = vector.extract_strided_slice %28 {offsets = [0, 0], sizes = [8, 2], strides = [1, 1]} : vector<8x128xf32> to vector<8x2xf32>
    %30 = tpu.transpose %29, [1, 0] : vector<8x2xf32> -> vector<2x8xf32>
    %c0_15 = arith.constant 0 : index
    %c0_16 = arith.constant 0 : index
    %31 = vector.load %arg5[%c0_15, %c0_16] : memref<2x8xf32, #tpu.memory_space<vmem>>, vector<2x8xf32>
    tpu.vector_store %arg5[%c0_15, %c0_16], %30 {strides = array<i32>} : memref<2x8xf32, #tpu.memory_space<vmem>>, vector<2x8xf32>,
    return
  }
  func.func @transform_0(%arg0: i32) -> (i32, i32) {
    %c0_i32 = arith.constant 0 : i32
    %c0_i32_0 = arith.constant 0 : i32
    return %arg0, %c0_i32 : i32, i32
  }
  func.func @transform_1(%arg0: i32) -> (i32, i32) {
    %c0_i32 = arith.constant 0 : i32
    %c0_i32_0 = arith.constant 0 : i32
    return %arg0, %c0_i32 : i32, i32
  }
  func.func @transform_2(%arg0: i32) -> (i32, i32) {
    %c0_i32 = arith.constant 0 : i32
    %c0_i32_0 = arith.constant 0 : i32
    %c0_i32_1 = arith.constant 0 : i32
    return %c0_i32, %c0_i32_0 : i32, i32
  }
  func.func @transform_3(%arg0: i32) -> (i32, i32) {
    %c0_i32 = arith.constant 0 : i32
    %c0_i32_0 = arith.constant 0 : i32
    %c0_i32_1 = arith.constant 0 : i32
    return %c0_i32, %c0_i32_0 : i32, i32
  }
  func.func @transform_4(%arg0: i32) -> (i32, i32) {
    %c0_i32 = arith.constant 0 : i32
    %c0_i32_0 = arith.constant 0 : i32
    return %c0_i32, %arg0 : i32, i32
  }
}

</mosaic_0001>

<bundles_post_ra>
// kernel: critic_forward.1
= control target key start
LH: loop header
LB: loop body
LE: loop exit
PB: predicated region body
PF: predicated region fallthrough
CT: control target
= control target key end

     0   :  { %9 = vsyncpa [#allocation3], 0  ;;  %s534_s15 = smov [#allocation2]   ;;  %s605_s0 = inlined_call_operand.vmem [shape: f32[8,8], index: 0, kind: input, shape index: {}]   ;;  %s606_s1 = inlined_call_operand.vmem [shape: f32[8,4], index: 1, kind: input, shape index: {}]   ;;  %s607_s2 = inlined_call_operand.hbm [shape: bf16[288,128], index: 2, kind: input, shape index: {}]   ;;  %s608_s3 = inlined_call_operand.vmem [shape: f32[3,128], index: 3, kind: input, shape index: {}]   ;;  %s609_s4 = inlined_call_operand.vmem [shape: f32[2,8], index: 4, kind: output, shape index: {}]  }
   0x1   :  { %s19_s16 = sshll.u32 %s534_s15, 4  ;;  %s20_s16 = int_to_ptr.vmem [resolvable:$true] %s19_s16 }
   0x2   :  { %s520_s17 = scalar_lea.vmem %s20_s16, 2304  ;;  %p525_p1 = scmp.lt.s32.totalorder %s20_s16, %s20_s16 }
   0x3   :  { %p521_p0 = scmp.ne.s32.totalorder %s20_s16, %s520_s17  ;;  %p526_p2 = scmp.lt.s32.totalorder %s520_s17, %s520_s17 }
   0x5   :  { %p527_p3 = por %p526_p2, %p525_p1 }
   0x7   :  { %p528_p4 = pnand %p527_p3, %p521_p0 }
   0x9   :  { %531 = shalt.err (!%p528_p4)
}
   0xa   :  { %s535_s18 = smov 64   ;;  %s536_s19 = smov 4  }
   0xb   :  { %25 = dma.hbm_to_vmem [thread:$0]  %s607_s2, 2304, %s20_s16, [#allocation3], %s535_s18, %s535_s18, %s536_s19  }
   0xc   :  { %532 = dma.done.wait [#allocation3], 2304  }
   0xd   :  { %533 = vsyncadd [#allocation3], 4294964992  ;;  %v537_v0 = vmov 0.0   ;;  %vm538_vm0 = vmmov 0   ;;  %vm43_vm1 = vcmask 1041408   ;;  %vm91_vm2 = vcmask 1043456  }
   0xe   :  { %439 = vmatprep.subr.bf16.mxu0 %v537_v0  ;;  %445 = vmatprep.subr.bf16.mxu1 %v537_v0  ;;  %vm39_vm3 = vcmask 31744   ;;  %v38_v1 = vld [vmem:[#allocation2 + $0x8] sm:$0x3]  ;;  %v37_v2 = vld [vmem:[#allocation2] sm:$0xf]  ;;  %vm87_vm4 = vcmask 64512   ;;  %v135_v23 = vlaneseq }
   0xf   :  { %441 = vmatprep.mubr.msk.bf16.mxu0 %vm538_vm0, %v537_v0  ;;  %447 = vmatprep.mubr.msk.bf16.mxu1 %vm538_vm0, %v537_v0  ;;  %v34_v3 = vld [vmem:[%s606_s1] sm:$0xff]  ;;  %v45_v4 = vsel %vm43_vm1, %v38_v1, 0  ;;  %v93_v5 = vsel %vm91_vm2, %v37_v2, 0  ;;  %v496_v8 = vld [vmem:[#allocation2 + $0x48] sm:$0xff]   ;;  %v498_v11 = vld [vmem:[#allocation2 + $0x38] sm:$0xff]   ;;  %vm392_vm5 = vcmask 58368  }
  0x10   :  { %v35_v6 = vpack.c.bf16 %v34_v3, %v34_v3  ;;  %v32_v7 = vld [vmem:[%s605_s0] sm:$0xff]  ;;  %440 = vmatpush3.bf16.msra.mxu0 %v45_v4  ;;  %446 = vmatpush3.bf16.msra.mxu1 %v93_v5  ;;  %v499_v12 = vld [vmem:[#allocation2 + $0x30] sm:$0xff]   ;;  %v500_v13 = vld [vmem:[#allocation2 + $0x28] sm:$0xff]   ;;  %v136_v24 = vshrl.u32 %v135_v23, 7 }
  0x11   :  { %v33_v9 = vpack.c.bf16 %v32_v7, %v32_v7  ;;  %451 = vmatprep.subr.bf16.mxu0 %v537_v0  ;;  %471 = vmatprep.subr.bf16.mxu1 %v537_v0  ;;  %v497_v10 = vld [vmem:[#allocation2 + $0x40] sm:$0xff]   ;;  %v502_v15 = vld [vmem:[#allocation2 + $0x18] sm:$0xff]   ;;  %v503_v16 = vld [vmem:[#allocation2 + $0x10] sm:$0xff]  }
  0x12   :  { %v501_v14 = vld [vmem:[#allocation2 + $0x20] sm:$0xff]   ;;  %v504_v17 = vld [vmem:[#allocation2 + $0x88] sm:$0xff]   ;;  %v506_v19 = vld [vmem:[#allocation2 + $0x78] sm:$0xff]   ;;  %v137_v25 = vsub.s32 0, %v136_v24  ;;  %v160_v42 = vsub.s32 1, %v136_v24  ;;  %v270_v51 = vsub.s32 2, %v136_v24 }
  0x13   :  { %442 = vmatmul.mubr.msk.bf16.vlgmr.msra.gmra.mxu0 %vm39_vm3, %v35_v6  ;;  %448 = vmatmul.mubr.msk.bf16.vlgmr.msra.gmra.mxu1 %vm87_vm4, %v33_v9  ;;  %v505_v18 = vld [vmem:[#allocation2 + $0x80] sm:$0xff]   ;;  %v507_v20 = vld [vmem:[#allocation2 + $0x70] sm:$0xff]   ;;  %v508_v21 = vld [vmem:[#allocation2 + $0x68] sm:$0xff]  }
  0x14   :  { %452 = vmatpush3.bf16.msra.mxu0 %v496_v8  ;;  %467 = vmatprep.mubr.msk.bf16.mxu0 %vm538_vm0, %v537_v0  ;;  %v509_v22 = vld [vmem:[#allocation2 + $0x60] sm:$0xff]   ;;  %v510_v40 = vld [vmem:[#allocation2 + $0x58] sm:$0xff]   ;;  %v511_v41 = vld [vmem:[#allocation2 + $0x50] sm:$0xff]  }
  0x15   :  { %453 = vmatprep.subr.bf16.mxu0 %v537_v0  ;;  %487 = vmatprep.mubr.msk.bf16.mxu1 %vm538_vm0, %v537_v0  ;;  %v36_v26 = vld [vmem:[%s608_s3] sm:$0x7] }
  0x16   :  { %472 = vmatpush3.bf16.msra.mxu1 %v504_v17  ;;  %v138_v27 = vrot.slane %v36_v26, %v137_v25  ;;  %v161_v43 = vrot.slane %v36_v26, %v160_v42  ;;  %v271_v52 = vrot.slane %v36_v26, %v270_v51 }
  0x17   :  { %473 = vmatprep.subr.bf16.mxu1 %v537_v0 }
  0x18   :  { %454 = vmatpush3.bf16.msra.mxu0 %v497_v10 }
  0x19   :  { %455 = vmatprep.subr.bf16.mxu0 %v537_v0 }
  0x1a   :  { %474 = vmatpush3.bf16.msra.mxu1 %v505_v18 }
  0x1b   :  { %475 = vmatprep.subr.bf16.mxu1 %v537_v0 }
  0x1c   :  { %456 = vmatpush3.bf16.msra.mxu0 %v498_v11 }
  0x1d   :  { %457 = vmatprep.subr.bf16.mxu0 %v537_v0 }
  0x1e   :  { %476 = vmatpush3.bf16.msra.mxu1 %v506_v19 }
  0x1f   :  { %477 = vmatprep.subr.bf16.mxu1 %v537_v0 }
  0x20   :  { %458 = vmatpush3.bf16.msra.mxu0 %v499_v12 }
  0x21   :  { %459 = vmatprep.subr.bf16.mxu0 %v537_v0 }
  0x22   :  { %478 = vmatpush3.bf16.msra.mxu1 %v507_v20 }
  0x23   :  { %479 = vmatprep.subr.bf16.mxu1 %v537_v0 }
  0x24   :  { %460 = vmatpush3.bf16.msra.mxu0 %v500_v13 }
  0x25   :  { %461 = vmatprep.subr.bf16.mxu0 %v537_v0 }
  0x26   :  { %480 = vmatpush3.bf16.msra.mxu1 %v508_v21 }
  0x27   :  { %481 = vmatprep.subr.bf16.mxu1 %v537_v0 }
  0x28   :  { %462 = vmatpush3.bf16.msra.mxu0 %v501_v14 }
  0x29   :  { %463 = vmatprep.subr.bf16.mxu0 %v537_v0 }
  0x2a   :  { %482 = vmatpush3.bf16.msra.mxu1 %v509_v22 }
  0x2b   :  { %483 = vmatprep.subr.bf16.mxu1 %v537_v0 }
  0x2c   :  { %464 = vmatpush3.bf16.msra.mxu0 %v502_v15 }
  0x2d   :  { %465 = vmatprep.subr.bf16.mxu0 %v537_v0 }
  0x2e   :  { %484 = vmatpush3.bf16.msra.mxu1 %v510_v40 }
  0x2f   :  { %485 = vmatprep.subr.bf16.mxu1 %v537_v0 }
  0x30   :  { %466 = vmatpush3.bf16.msra.mxu0 %v503_v16 }
  0x32   :  { %486 = vmatpush3.bf16.msra.mxu1 %v511_v41 }
  0xd3   :  { %v81_v28 = vpop.f32.mrf.mxu0  ;;  %v129_v29 = vpop.f32.mrf.mxu1 }
  0xd4   :  { %v130_v30 = vadd.f32 %v129_v29, %v81_v28 }
  0xd5   :  { %v443_v31 = vpop.f32.mrf.mxu0  ;;  %v449_v32 = vpop.f32.mrf.mxu1 }
  0xd6   :  { %v139_v33 = vadd.f32 %v138_v27, %v130_v30 }
  0xd7   :  { %v84_v34 = vpop.f32.mrf.mxu0  ;;  %v132_v35 = vpop.f32.mrf.mxu1 }
  0xd8   :  { %v140_v36 = vmax.f32 %v139_v33, 0.0 }
  0xd9   :  { %v444_v37 = vpop.f32.mrf.mxu0  ;;  %v450_v38 = vpop.f32.mrf.mxu1 }
  0xda   :  { %v141_v39 = vpack.c.bf16 %v140_v36, %v140_v36 }
  0xdc   :  { %468 = vmatmul.mubr.bf16.vlgmr.msra.gmra.mxu0 %v141_v39 }
 0x19c   :  { %v244_v44 = vpop.f32.mrf.mxu0 }
 0x19d   :  { %v245_v45 = vadd.f32 %v244_v44, %v161_v43 }
 0x19e   :  { %v469_v46 = vpop.f32.mrf.mxu0 }
 0x19f   :  { %v250_v47 = vmax.f32 %v245_v45, 0.0 }
 0x1a0   :  { %v247_v48 = vpop.f32.mrf.mxu0 }
 0x1a1   :  { %v251_v49 = vpack.c.bf16 %v250_v47, %v250_v47 }
 0x1a2   :  { %v470_v50 = vpop.f32.mrf.mxu0 }
 0x1a3   :  { %488 = vmatmul.mubr.bf16.vlgmr.msra.gmra.mxu1 %v251_v49 }
 0x263   :  { %v354_v53 = vpop.f32.mrf.mxu1 }
 0x264   :  { %v355_v54 = vadd.f32 %v354_v53, %v271_v52 }
 0x265   :  { %v489_v55 = vpop.f32.mrf.mxu1 }
 0x266   :  { %360 = vxpose.xlu0.b32.start.end [1/1] (short) (narrow) %v355_v54, 8 }
 0x267   :  { %v357_v56 = vpop.f32.mrf.mxu1 }
 0x269   :  { %v490_v57 = vpop.f32.mrf.mxu1 }
 0x2e2   :  { %v376_v58 = vpop.trf.xlu0 }
 0x2e3   :  { %393 = vst.msk [vmem:[%s609_s4] sm:$0x3] %vm392_vm5, %v376_v58 }
 0x2e4   :  { %398 = vsyncpa [#allocation3], 1 }

</bundles_post_ra>
